<compile_context>
chip_gen: v7x
topology: tpu7x:2x2x1
jax: 0.10.0
libtpu: 0.0.40
codegen_flags: <defaults>
</compile_context>

<pallas_src>
import math
import re
from functools import partial

import jax
import jax.numpy as jnp
from jax import lax
from jax.experimental import pallas as pl
from jax.experimental.pallas import tpu as pltpu

_LANES = 128


# ----------------------------- kernels --------------------------------------


def _gelu_kernel(x_ref, o_ref, *, compute_dtype):
    # Exact (erf-based) GELU, matching torch's x * 0.5 * (1 + erf(x/sqrt(2))).
    x = x_ref[...].astype(compute_dtype)
    y = x * 0.5 * (1.0 + lax.erf(x * (1.0 / math.sqrt(2.0))))
    o_ref[...] = y.astype(o_ref.dtype)


def _gelu_tanh_kernel(x_ref, o_ref, *, compute_dtype):
    # tanh-approximate GELU: tanh runs on the EUP (its own bundle slot), so the
    # kernel stays mem-bound on v7x.  NOT bit-identical to the erf formulation.
    x = x_ref[...].astype(compute_dtype)
    c = math.sqrt(2.0 / math.pi)
    y = 0.5 * x * (1.0 + jnp.tanh(c * (x + 0.044715 * x * x * x)))
    o_ref[...] = y.astype(o_ref.dtype)


def _relu_kernel(x_ref, o_ref):
    o_ref[...] = jnp.maximum(x_ref[...], 0)  # scalar 0: no materialized zero tile


# ----------------------------- chip config -----------------------------------


def _chip_generation() -> int:
    try:
        kind = jax.devices()[0].device_kind.lower()
    except Exception:
        return 0
    m = re.search(r"(\d+)", kind)
    return int(m.group(1)) if m else 0


def _tpu_config():
    gen = _chip_generation()
    if gen >= 7:
        # 6 MiB blocks -> (in+out) x 2 buffers = 24 MiB; explicit 40 MiB scoped
        # VMEM (64 MiB physical).  2 TCs -> keep >= 2 grid steps when possible.
        return dict(block_bytes=6 << 20, vmem_limit=40 << 20, two_tc=True,
                    prefer_tanh_gelu=True, bf16_math=True)
    if gen == 6:
        return dict(block_bytes=4 << 20, vmem_limit=None, two_tc=False,
                    prefer_tanh_gelu=False, bf16_math=True)
    # v5e / unknown: conservative (16 MiB scoped-VMEM default).
    return dict(block_bytes=2 << 20, vmem_limit=None, two_tc=False,
                prefer_tanh_gelu=False, bf16_math=False)


# ----------------------------- tiling ----------------------------------------


def _sublane(dtype) -> int:
    # Sublane packing granularity: 8 for 4-byte, 16 for 2-byte, 32 for 1-byte.
    itemsize = jnp.dtype(dtype).itemsize
    return max(8, 32 // itemsize)


def _choose_block(rows, cols, itemsize, sub, block_bytes, two_tc):
    """Pick (block_rows, block_cols). Each dim is a multiple of the HW tile or
    equal to the full array dim, so Pallas masks ragged boundaries."""
    row_bytes = cols * itemsize
    if row_bytes * sub <= block_bytes:
        # Full-width rows; tile over rows only.
        block_cols = cols
        block_rows = max(sub, (block_bytes // max(row_bytes, 1)) // sub * sub)
        if two_tc and rows >= 2 * sub:
            # Keep >= 2 grid steps so both v7x TensorCores get work.
            block_rows = min(block_rows, max(sub, (rows // 2) // sub * sub))
        block_rows = min(block_rows, rows)
    else:
        # Very wide rows: also tile over lanes so VMEM stays bounded.
        block_rows = min(sub, rows)
        block_cols = max(
            _LANES, (block_bytes // (block_rows * itemsize)) // _LANES * _LANES
        )
        block_cols = min(block_cols, cols)
    return block_rows, block_cols


def _run_elementwise_2d(x2d, kernel, out_dtype, *, block_bytes, vmem_limit, two_tc):
    rows, cols = x2d.shape
    sub = _sublane(x2d.dtype)
    itemsize = jnp.dtype(x2d.dtype).itemsize
    br, bc = _choose_block(rows, cols, itemsize, sub, block_bytes, two_tc)
    grid = (pl.cdiv(rows, br), pl.cdiv(cols, bc))

    cp_kwargs = dict(dimension_semantics=("parallel", "parallel"))
    if vmem_limit is not None:
        cp_kwargs["vmem_limit_bytes"] = vmem_limit

    # TODO(synk): if xprof shows exposed DMA on v7x, try
    # pipeline_mode=pl.Buffered(3) on the input spec (budget VMEM accordingly).
    return pl.pallas_call(
        kernel,
        out_shape=jax.ShapeDtypeStruct((rows, cols), out_dtype),
        grid_spec=pltpu.PrefetchScalarGridSpec(
            num_scalar_prefetch=0,
            grid=grid,
            in_specs=[pl.BlockSpec((br, bc), lambda i, j: (i, j))],
            out_specs=pl.BlockSpec((br, bc), lambda i, j: (i, j)),
        ),
        compiler_params=pltpu.CompilerParams(**cp_kwargs),
    )(x2d)


# ----------------------------- public wrapper --------------------------------


def activate_fun(x, activate_fun: str = "gelu", *, approximate_gelu=None,
                 _block_bytes=None):
    """Pallas implementation of ActivateFun.forward.

    x: any-shape float array. activate_fun in {'relu', 'gelu'}.

    approximate_gelu:
      None  -> auto: exact erf GELU on v5e/v6e (bit-matches torch);
               tanh-approximate GELU on v7x (where exact erf is VALU-bound).
               NOTE: on v7x this auto default is NOT bit-identical to torch.
      False -> force exact erf GELU everywhere.
      True  -> force tanh-approximate GELU everywhere.
    """
    cfg = _tpu_config()
    block_bytes = _block_bytes if _block_bytes is not None else cfg["block_bytes"]

    if activate_fun == "relu":
        kernel = _relu_kernel
    elif activate_fun == "gelu":
        use_tanh = cfg["prefer_tanh_gelu"] if approximate_gelu is None else approximate_gelu
        if use_tanh:
            # bf16-internal math on v6e/v7x halves VALU/vreg pressure; v5e has
            # no bf16 VPU/EUP so it stays f32 there.
            cd = x.dtype if (cfg["bf16_math"] and x.dtype == jnp.bfloat16) else jnp.float32
            kernel = partial(_gelu_tanh_kernel, compute_dtype=cd)
        else:
            # Exact erf kept in f32 for bit-fidelity (and v5e support).
            kernel = partial(_gelu_kernel, compute_dtype=jnp.float32)
    else:
        raise ValueError(f"unsupported activate_fun: {activate_fun}")

    orig_shape = x.shape
    n = x.size
    if n == 0:
        return x

    last = orig_shape[-1] if x.ndim >= 1 else 1
    lead = n // last

    # Zero-copy 2-D views only (no pad/slice HBM round-trips):
    if last < _LANES and n % _LANES == 0:
        # Tiny last dim but total size is lane-divisible: flatten lane-dense.
        x2d = x.reshape(n // _LANES, _LANES)
    else:
        # General case: (lead, last) view; Pallas masks ragged boundary blocks
        # and partial-lane stores when last % 128 != 0.
        x2d = x.reshape(lead, last)

    out = _run_elementwise_2d(
        x2d, kernel, x.dtype,
        block_bytes=block_bytes, vmem_limit=cfg["vmem_limit"], two_tc=cfg["two_tc"],
    )
    return out.reshape(orig_shape)


# ----------------------------- reference / test ------------------------------


def _ref_gelu(x):
    return x * 0.5 * (1.0 + lax.erf(x / math.sqrt(2.0)))


if __name__ == "__main__":
    key = jax.random.PRNGKey(0)
    k1, k2, k3, k4, k5 = jax.random.split(key, 5)

    # Small last dim, lane-divisible total -> flattened (4, 128) path.
    x_small = jax.random.normal(k1, (2, 8, 32), dtype=jnp.float32)
    # Truly ragged shape -> direct (21, 33) view with masked boundaries.
    x_ragged = jax.random.normal(k2, (3, 7, 33), dtype=jnp.float32)
    # Tileable shape -> (32, 256) view.
    x_fast = jax.random.normal(k3, (4, 8, 256), dtype=jnp.float32)
    # bf16 input (f32 math for exact erf, bf16 I/O).
    x_bf16 = jax.random.normal(k4, (4, 8, 256), dtype=jnp.bfloat16)
    # Wide-row input with a tiny block-byte override to exercise the 2-D grid.
    x_wide = jax.random.normal(k5, (4, 1024), dtype=jnp.float32)

    results = []
    for x in (x_small, x_ragged, x_fast):
        y_g = activate_fun(x, "gelu", approximate_gelu=False)
        y_r = activate_fun(x, "relu")
        results += [y_g, y_r]
        ref_g = _ref_gelu(x)
        ref_r = jnp.maximum(x, 0.0)
        assert y_g.shape == x.shape and y_g.dtype == x.dtype
        assert y_r.shape == x.shape and y_r.dtype == x.dtype
        assert jnp.allclose(y_g, ref_g, atol=1e-6), "gelu mismatch"
        assert jnp.allclose(y_r, ref_r, atol=1e-6), "relu mismatch"

    # Wide-row / 2-D grid path (col chunks of 128 lanes).
    y_wide = activate_fun(x_wide, "gelu", approximate_gelu=False, _block_bytes=4096)
    results.append(y_wide)
    assert jnp.allclose(y_wide, _ref_gelu(x_wide), atol=1e-6), "wide gelu mismatch"

    # bf16 exact-erf GELU (f32 math inside, cast on store).
    y_g16 = activate_fun(x_bf16, "gelu", approximate_gelu=False)
    results.append(y_g16)
    ref_g16 = _ref_gelu(x_bf16.astype(jnp.float32)).astype(jnp.bfloat16)
    assert y_g16.shape == x_bf16.shape and y_g16.dtype == jnp.bfloat16
    assert jnp.allclose(
        y_g16.astype(jnp.float32), ref_g16.astype(jnp.float32), atol=2e-2
    ), "bf16 gelu mismatch"

    # tanh-approximate GELU (loose tolerance vs exact erf GELU).
    y_gt = activate_fun(x_fast, "gelu", approximate_gelu=True)
    results.append(y_gt)
    assert jnp.allclose(y_gt, _ref_gelu(x_fast), atol=1e-2), "tanh gelu mismatch"

    # bf16 tanh GELU (bf16-internal math on v6e/v7x, f32 on v5e).
    y_gt16 = activate_fun(x_bf16, "gelu", approximate_gelu=True)
    results.append(y_gt16)
    assert jnp.allclose(
        y_gt16.astype(jnp.float32),
        _ref_gelu(x_bf16.astype(jnp.float32)),
        atol=5e-2,
    ), "bf16 tanh gelu mismatch"

    jax.block_until_ready(results)
    print("KERNEL_OK")
</pallas_src>

<mosaic_0001>
module attributes {stable_mosaic.version = 11 : i64} {
  func.func @_gelu_kernel(%arg0: i32, %arg1: i32, %arg2: memref<4x128xf32, #tpu.memory_space<vmem>>, %arg3: memref<4x128xf32, #tpu.memory_space<vmem>>) attributes {dimension_semantics = [#tpu.dimension_semantics<parallel>, #tpu.dimension_semantics<parallel>], iteration_bounds = array<i64: 1, 1>, scalar_prefetch = 0 : i64, scratch_operands = 0 : i64, tpu.core_type = #tpu.core_type<tc>, window_params = [{transform_indices = @transform_0, window_bounds = array<i64: 4, 128>}, {transform_indices = @transform_1, window_bounds = array<i64: 4, 128>}]} {
    %c0 = arith.constant 0 : index
    %c0_0 = arith.constant 0 : index
    %0 = vector.load %arg2[%c0, %c0_0] : memref<4x128xf32, #tpu.memory_space<vmem>>, vector<4x128xf32>
    %cst = arith.constant 5.000000e-01 : f32
    %1 = vector.broadcast %cst : f32 to vector<4x128xf32>
    %2 = arith.mulf %0, %1 : vector<4x128xf32>
    %cst_1 = arith.constant 0.707106769 : f32
    %3 = vector.broadcast %cst_1 : f32 to vector<4x128xf32>
    %4 = arith.mulf %0, %3 : vector<4x128xf32>
    %5 = math.erf %4 : vector<4x128xf32>
    %cst_2 = arith.constant 1.000000e+00 : f32
    %6 = vector.broadcast %cst_2 : f32 to vector<4x128xf32>
    %7 = arith.addf %6, %5 : vector<4x128xf32>
    %8 = arith.mulf %2, %7 : vector<4x128xf32>
    %c0_3 = arith.constant 0 : index
    %c0_4 = arith.constant 0 : index
    %9 = vector.load %arg3[%c0_3, %c0_4] : memref<4x128xf32, #tpu.memory_space<vmem>>, vector<4x128xf32>
    tpu.vector_store %arg3[%c0_3, %c0_4], %8 {strides = array<i32>} : memref<4x128xf32, #tpu.memory_space<vmem>>, vector<4x128xf32>,
    return
  }
  func.func @transform_0(%arg0: i32, %arg1: i32) -> (i32, i32) {
    %c0_i32 = arith.constant 0 : i32
    return %arg0, %arg1 : i32, i32
  }
  func.func @transform_1(%arg0: i32, %arg1: i32) -> (i32, i32) {
    %c0_i32 = arith.constant 0 : i32
    return %arg0, %arg1 : i32, i32
  }
}

</mosaic_0001>

<bundles_post_ra>
// kernel: tpu_custom_call.1
= control target key start
LH: loop header
LB: loop body
LE: loop exit
PB: predicated region body
PF: predicated region fallthrough
CT: control target
= control target key end

     0   :  { %6 = vsyncpa [#allocation3], 0  ;;  %s131_s0 = inlined_call_operand.hbm [shape: f32[4,128], index: 0, kind: input, shape index: {}]   ;;  %s132_s1 = inlined_call_operand.hbm [shape: f32[4,128], index: 1, kind: output, shape index: {}]  }
   0x1   :  { %7 = vsyncpa [#allocation4], 0  ;;  %s95_s6 = smov [#allocation2]   ;;  %s47_s10 = scalar_lea.hbm %s131_s0, 64 }
   0x2   :  { %s14_s7 = sshll.u32 %s95_s6, 4  ;;  %p48_p0 = scmp.ne.s32.totalorder %s131_s0, %s47_s10  ;;  %s15_s7 = int_to_ptr.vmem [resolvable:$true] %s14_s7 }
   0x3   :  { %p51_p1 = scmp.lt.u32.totalorder %s47_s10, %s131_s0 }
   0x5   :  { %p53_p2 = pnand %p51_p1, %p48_p0 }
   0x7   :  { %56 = shalt.err (!%p53_p2)
}
   0x8   :  { %s57_s15 = scalar_lea.vmem %s15_s7, 64  ;;  %p62_p4 = scmp.lt.s32.totalorder %s15_s7, %s15_s7 }
   0x9   :  { %p58_p3 = scmp.ne.s32.totalorder %s15_s7, %s57_s15  ;;  %p63_p5 = scmp.lt.s32.totalorder %s57_s15, %s57_s15 }
   0xb   :  { %p64_p6 = por %p63_p5, %p62_p4 }
   0xd   :  { %p65_p7 = pnand %p64_p6, %p58_p3 }
   0xf   :  { %68 = shalt.err (!%p65_p7)
}
  0x10   :  { %17 = dma.hbm_to_vmem [thread:$0]  %s131_s0, 64, %s15_s7, [#allocation3]  }
  0x11   :  { %91 = dma.done.wait [#allocation3], 64  }
  0x12   :  { %92 = vsyncadd [#allocation3], 4294967232  ;;  %v21_v0 = vld [vmem:[#allocation2] sm:$0xf]  ;;  %s96_s18 = smov [#allocation5]  }
  0x13   :  { %v23_v1 = vmul.f32 0.70710677, %v21_v0  ;;  %v22_v2 = vmul.f32 0.5, %v21_v0  ;;  %s34_s19 = sshll.u32 %s96_s18, 4  ;;  %s35_s19 = int_to_ptr.vmem [resolvable:$true] %s34_s19 }
  0x14   :  { %s69_s20 = scalar_lea.vmem %s35_s19, 64  ;;  %p74_p9 = scmp.lt.s32.totalorder %s35_s19, %s35_s19 }
  0x15   :  { %45 = verf.f32 %v23_v1  ;;  %p70_p8 = scmp.ne.s32.totalorder %s35_s19, %s69_s20  ;;  %p75_p10 = scmp.lt.s32.totalorder %s69_s20, %s69_s20 }
  0x17   :  { %p76_p11 = por %p75_p10, %p74_p9 }
  0x19   :  { %p77_p12 = pnand %p76_p11, %p70_p8 }
  0x1f   :  { %v46_v3 = vpop.eup %45 }
  0x20   :  { %v25_v4 = vadd.f32 1.0, %v46_v3 }
  0x22   :  { %v26_v5 = vmul.f32 %v25_v4, %v22_v2 }
  0x24   :  { %27 = vst [vmem:[#allocation5] sm:$0xf] %v26_v5 }
  0x25   :  { %80 = shalt.err (!%p77_p12)
}
  0x26   :  { %s81_s22 = scalar_lea.hbm %s132_s1, 64 }
  0x27   :  { %p82_p13 = scmp.ne.s32.totalorder %s132_s1, %s81_s22  ;;  %p85_p0 = scmp.lt.u32.totalorder %s81_s22, %s132_s1 }
  0x29   :  { %p87_p1 = pnand %p85_p0, %p82_p13 }
  0x2b   :  { %90 = shalt.err (!%p87_p1)
}
  0x2c   :  { %37 = dma.vmem_to_hbm [thread:$0]  %s35_s19, 64, %s132_s1, [#allocation4]  }
  0x2d   :  { %93 = dma.done.wait [#allocation4], 64  }
  0x2e   :  { %94 = vsyncadd [#allocation4], 4294967232 }
  0x2f   :  { %41 = vsyncpa [#allocation3], 1 }
  0x30   :  { %42 = vsyncpa [#allocation4], 1 }

</bundles_post_ra>
